<compile_context>
chip_gen: v7x
topology: tpu7x:2x2x1
jax: 0.10.0
libtpu: 0.0.40
codegen_flags: <defaults>
</compile_context>

<pallas_src>
import functools

import jax
import jax.numpy as jnp
from jax import lax
from jax.experimental import pallas as pl
from jax.experimental.pallas import tpu as pltpu

ALPHA = 0.5
EPS = 1e-12  # F.normalize eps


def _pick_block_m(m):
    """Largest row-block (multiple of 8, <=256) that divides M; prefer >=2 blocks."""
    for c in (256, 128, 64, 32, 16, 8):
        if m % c == 0 and m // c >= 2:
            return c
    for c in (256, 128, 64, 32, 16, 8):
        if m % c == 0:
            return c
    return m


def _kmgcl_kernel(xc_ref,      # [M, F]  carbon-node raw features (VMEM, resident)
                  px_ref,      # [B, F]  pool @ x                (VMEM, resident)
                  w_ref,       # [F, D]  projection weight
                  b_ref,       # [1, D]  projection bias
                  fp_ref,      # [B, FP] bf16 fingerprints (0/1, exact)
                  losses_ref,  # [3] f32 SMEM out: loss, node_loss, graph_loss
                  logits_ref,  # [B, B] f32 VMEM out: graph logits
                  n_scratch,   # [M, D] f32 VMEM scratch: normalized carbon embeddings
                  acc_ref,     # [1]   f32 SMEM scratch: node-loss accumulator
                  *, block_m):
    i = pl.program_id(0)

    # ---- step 0: project + L2-normalize ALL carbon rows once; zero accumulator
    @pl.when(i == 0)
    def _init():
        n_all = jnp.dot(xc_ref[...], w_ref[...],
                        preferred_element_type=jnp.float32) + b_ref[...]      # [M, D]
        n_all = n_all / jnp.maximum(
            jnp.sqrt(jnp.sum(n_all * n_all, axis=1, keepdims=True)), EPS)
        n_scratch[...] = n_all
        acc_ref[0] = 0.0

    # TODO(synk): the PyTorch forward also builds `pairwise_embeddings_matrix`
    # (all concatenated node-embedding pairs) but never uses it; skipped here.

    # ---- per-step: streaming logsumexp over one row block of sim = n_blk @ n.T
    #      CE(sim, eye) = mean_i(logsumexp_j sim_ij - sim_ii); sim_ii = sum(n_i^2),
    #      so no [M, M] eye/iota target and no full [M, M] tile are ever built.
    row0 = pl.multiple_of(i * block_m, block_m)
    n_blk = n_scratch[pl.ds(row0, block_m), :]                                # [tm, D]
    sim = lax.dot_general(n_blk, n_scratch[...], (((1,), (1,)), ((), ())),
                          preferred_element_type=jnp.float32)                 # [tm, M]
    row_max = jnp.max(sim, axis=-1, keepdims=True)
    row_lse = row_max + jnp.log(jnp.sum(jnp.exp(sim - row_max),
                                        axis=-1, keepdims=True))              # [tm, 1]
    diag = jnp.sum(n_blk * n_blk, axis=1, keepdims=True)                      # [tm, 1]
    acc_ref[0] += jnp.sum(row_lse - diag)

    # ---- last step: graph branch + combine losses
    @pl.when(i == pl.num_programs(0) - 1)
    def _finalize():
        M = n_scratch.shape[0]
        B = px_ref.shape[0]

        # graph embedding: (pool @ x) @ w + b, then L2-normalize
        g = jnp.dot(px_ref[...], w_ref[...],
                    preferred_element_type=jnp.float32) + b_ref[...]          # [B, D]
        g = g / jnp.maximum(jnp.sqrt(jnp.sum(g * g, axis=1, keepdims=True)), EPS)

        logits = lax.dot_general(g, g, (((1,), (1,)), ((), ())),
                                 preferred_element_type=jnp.float32)          # [B, B]
        logits_ref[...] = logits

        # graph metric ('fingerprint'): softmax(Tanimoto similarity)
        fp = fp_ref[...]
        inter = lax.dot_general(fp, fp, (((1,), (1,)), ((), ())),
                                preferred_element_type=jnp.float32)           # [B, B]
        fp_sum = jnp.sum(fp.astype(jnp.float32), axis=-1, keepdims=True)      # [B, 1]
        # NOTE: matches PyTorch exactly, incl. NaN for an all-zero fingerprint row.
        tanimoto = inter / (fp_sum + jnp.transpose(fp_sum) - inter)
        tmax = jnp.max(tanimoto, axis=-1, keepdims=True)
        texp = jnp.exp(tanimoto - tmax)
        metric = texp / jnp.sum(texp, axis=-1, keepdims=True)                 # [B, B]

        # graph loss: CE(L, metric) + CE(L.T, metric.T).  L = g g^T is symmetric,
        # so the column logsumexp equals the transposed row logsumexp:
        #   = (1/B) * sum_ij metric_ij * (r_lse_i + r_lse_j - 2 L_ij)
        r_max = jnp.max(logits, axis=-1, keepdims=True)
        r_lse = r_max + jnp.log(jnp.sum(jnp.exp(logits - r_max),
                                        axis=-1, keepdims=True))              # [B, 1]
        graph_loss = jnp.sum(
            metric * (r_lse + jnp.transpose(r_lse) - 2.0 * logits)) * (1.0 / B)

        node_loss = acc_ref[0] * (1.0 / M)
        losses_ref[0] = ALPHA * node_loss + (1.0 - ALPHA) * graph_loss
        losses_ref[1] = node_loss
        losses_ref[2] = graph_loss


@functools.partial(jax.jit, static_argnames=("num_carbons",))
def kmgcl_forward(x, w, b, pool, fingerprint, *, num_carbons):
    N, F = x.shape
    D = w.shape[1]
    B, FP = fingerprint.shape
    M = num_carbons

    # TODO(synk): PyTorch uses dynamic torch.nonzero(); JAX needs a static count,
    # so fewer than `num_carbons` carbons would pad with row 0 (duplicating it).
    carbon_idx = jnp.where(x[:, 0] == 5.0, size=M)[0].astype(jnp.int32)

    # Gather the M carbon feature rows BEFORE projection (one small XLA gather),
    # replacing the old in-kernel unrolled per-row copy loop.
    x_carbon = jnp.take(x, carbon_idx, axis=0)                                # [M, F]

    # Reassociated pooling: graphEmb = (pool @ x) @ w + b  (== pool @ (x@w + b)
    # because mean-pool rows sum to 1); [N, D] is never materialized.
    px = jnp.dot(pool, x, preferred_element_type=jnp.float32)                 # [B, F]

    # 0/1 fingerprints are exact in bf16 -> bf16 MXU path is numerically exact.
    fp_bf16 = fingerprint.astype(jnp.bfloat16)

    block_m = _pick_block_m(M)
    num_blocks = M // block_m

    grid_spec = pltpu.PrefetchScalarGridSpec(
        num_scalar_prefetch=0,
        grid=(num_blocks,),
        in_specs=[
            pl.BlockSpec((M, F), lambda i: (0, 0)),     # carbon features (resident)
            pl.BlockSpec((B, F), lambda i: (0, 0)),     # pool @ x
            pl.BlockSpec((F, D), lambda i: (0, 0)),     # w
            pl.BlockSpec((1, D), lambda i: (0, 0)),     # b
            pl.BlockSpec((B, FP), lambda i: (0, 0)),    # fingerprints
        ],
        out_specs=(
            pl.BlockSpec(memory_space=pltpu.MemorySpace.SMEM),   # scalar losses
            pl.BlockSpec((B, B), lambda i: (0, 0)),              # graph logits
        ),
        scratch_shapes=[
            pltpu.VMEM((M, D), jnp.float32),   # normalized carbon embeddings
            pltpu.SMEM((1,), jnp.float32),     # node-loss accumulator
        ],
    )

    losses, logits = pl.pallas_call(
        functools.partial(_kmgcl_kernel, block_m=block_m),
        out_shape=(jax.ShapeDtypeStruct((3,), jnp.float32),
                   jax.ShapeDtypeStruct((B, B), jnp.float32)),
        grid_spec=grid_spec,
        compiler_params=pltpu.CompilerParams(
            dimension_semantics=("arbitrary",)),
    )(x_carbon, px, w, b, fp_bf16)

    return losses[0], losses[1], losses[2], logits


# ----------------------------------------------------------------------------
# Pure-JAX reference (mirrors the PyTorch forward) for verification
# ----------------------------------------------------------------------------
def reference(x, w, b, pool, fp, num_carbons):
    node_all = x @ w + b
    graph_emb = pool @ node_all
    carbon_idx = jnp.where(x[:, 0] == 5.0, size=num_carbons)[0]
    node_emb = node_all[carbon_idx]

    g = graph_emb / jnp.maximum(
        jnp.linalg.norm(graph_emb, axis=1, keepdims=True), EPS)
    n = node_emb / jnp.maximum(
        jnp.linalg.norm(node_emb, axis=1, keepdims=True), EPS)

    def ce(l, t):
        return jnp.mean(-jnp.sum(t * jax.nn.log_softmax(l, axis=-1), axis=-1))

    sim_n = n @ n.T
    node_loss = ce(sim_n, jnp.eye(n.shape[0], dtype=jnp.float32))

    inter = fp @ fp.T
    s = fp.sum(-1)
    tan = inter / (s[None, :] + s[:, None] - inter)
    metric = jax.nn.softmax(tan, axis=-1)

    logits = g @ g.T
    graph_loss = ce(logits, metric) + ce(logits.T, metric.T)
    loss = ALPHA * node_loss + (1.0 - ALPHA) * graph_loss
    return loss, node_loss, graph_loss, logits


if __name__ == "__main__":
    key = jax.random.PRNGKey(0)
    k1, k2, k3, k4, _ = jax.random.split(key, 5)

    N, F, D, B, FP = 32, 8, 32, 4, 64   # nodes, node-feat, embed, graphs, fp-bits

    # node features: column 0 is the atom type; carbons (5.0) at even indices
    atom_type = jnp.where(jnp.arange(N) % 2 == 0, 5.0, 6.0).astype(jnp.float32)
    num_carbons = 16                     # -> block_m=8, 2 streamed row blocks
    feats = jax.random.normal(k1, (N, F - 1), dtype=jnp.float32)
    x = jnp.concatenate([atom_type[:, None], feats], axis=1)            # [N, F]

    # deterministic "graph encoder" parameters
    w = 0.1 * jax.random.normal(k2, (F, D), dtype=jnp.float32)          # [F, D]
    b = 0.1 * jax.random.normal(k3, (1, D), dtype=jnp.float32)          # [1, D]

    # node -> graph assignment (8 nodes per graph), mean pooling matrix
    assign = jnp.repeat(jnp.arange(B), N // B)                          # [N]
    pool = (jax.nn.one_hot(assign, B, dtype=jnp.float32).T) / (N // B)  # [B, N]

    # binary fingerprints
    fingerprint = (jax.random.uniform(k4, (B, FP)) > 0.4).astype(jnp.float32)

    loss, node_loss, graph_loss, graph_logits = jax.block_until_ready(
        kmgcl_forward(x, w, b, pool, fingerprint, num_carbons=num_carbons))

    ref_loss, ref_nl, ref_gl, ref_logits = reference(
        x, w, b, pool, fingerprint, num_carbons)

    assert jnp.allclose(loss, ref_loss, rtol=1e-5, atol=1e-5), (loss, ref_loss)
    assert jnp.allclose(node_loss, ref_nl, rtol=1e-5, atol=1e-5), (node_loss, ref_nl)
    assert jnp.allclose(graph_loss, ref_gl, rtol=1e-5, atol=1e-5), (graph_loss, ref_gl)
    assert jnp.allclose(graph_logits, ref_logits, rtol=1e-5, atol=1e-5)

    print("KERNEL_OK")
</pallas_src>

<mosaic_0001>
module attributes {stable_mosaic.version = 11 : i64} {
  func.func private @main(%arg0: i32) attributes {dimension_semantics = [#tpu.dimension_semantics<core_parallel>], iteration_bounds = array<i64: 2>, tpu.core_type = #tpu.core_type<sc_scalar_subcore>, window_params = []} {
    return
  }
}

module attributes {stable_mosaic.version = 11 : i64} {
  func.func private @main(%arg0: i32) attributes {dimension_semantics = [#tpu.dimension_semantics<core_parallel>], iteration_bounds = array<i64: 2>, tpu.core_type = #tpu.core_type<sc_scalar_subcore>, window_params = []} {
    return
  }
}

module attributes {stable_mosaic.version = 11 : i64} {
  func.func @_kmgcl_kernel(%arg0: i32, %arg1: memref<16x8xf32, #tpu.memory_space<vmem>>, %arg2: memref<4x8xf32, #tpu.memory_space<vmem>>, %arg3: memref<8x32xf32, #tpu.memory_space<vmem>>, %arg4: memref<1x32xf32, #tpu.memory_space<vmem>>, %arg5: memref<4x64xbf16, #tpu.memory_space<vmem>>, %arg6: memref<3xf32, #tpu.memory_space<smem>>, %arg7: memref<4x4xf32, #tpu.memory_space<vmem>>, %arg8: memref<16x32xf32, #tpu.memory_space<vmem>>, %arg9: memref<1xf32, #tpu.memory_space<smem>>) attributes {dimension_semantics = [#tpu.dimension_semantics<arbitrary>], iteration_bounds = array<i64: 2>, scalar_prefetch = 0 : i64, scratch_operands = 2 : i64, tpu.core_type = #tpu.core_type<tc>, window_params = [{pipeline_mode = #tpu.pipeline_mode<synchronous>, transform_indices = @transform_0, window_bounds = array<i64: 16, 8>}, {pipeline_mode = #tpu.pipeline_mode<synchronous>, transform_indices = @transform_1, window_bounds = array<i64: 4, 8>}, {pipeline_mode = #tpu.pipeline_mode<synchronous>, transform_indices = @transform_2, window_bounds = array<i64: 8, 32>}, {pipeline_mode = #tpu.pipeline_mode<synchronous>, transform_indices = @transform_3, window_bounds = array<i64: 1, 32>}, {pipeline_mode = #tpu.pipeline_mode<synchronous>, transform_indices = @transform_4, window_bounds = array<i64: 4, 64>}, {transform_indices = @transform_5, window_bounds = array<i64: 3>}, {pipeline_mode = #tpu.pipeline_mode<synchronous>, transform_indices = @transform_6, window_bounds = array<i64: 4, 4>}]} {
    %c0_i32 = arith.constant 0 : i32
    %0 = arith.cmpi eq, %arg0, %c0_i32 : i32
    %1 = arith.extui %0 : i1 to i32
    %c0_i32_0 = arith.constant 0 : i32
    %2 = arith.cmpi ne, %1, %c0_i32_0 : i32
    scf.if %2 {
      %c0_10 = arith.constant 0 : index
      %c0_11 = arith.constant 0 : index
      %32 = vector.load %arg1[%c0_10, %c0_11] : memref<16x8xf32, #tpu.memory_space<vmem>>, vector<16x8xf32>
      %c0_12 = arith.constant 0 : index
      %c0_13 = arith.constant 0 : index
      %33 = vector.load %arg3[%c0_12, %c0_13] : memref<8x32xf32, #tpu.memory_space<vmem>>, vector<8x32xf32>
      %cst_14 = arith.constant dense<0.000000e+00> : vector<16x32xf32>
      %34 = tpu.matmul %32, %33, %cst_14 {dimension_numbers = #tpu.dot_dimension_numbers<[1], [0], [0], [1], [0, 0, 1, 1], [], []>} : vector<16x8xf32>, vector<8x32xf32>, vector<16x32xf32> -> vector<16x32xf32>
      %c0_15 = arith.constant 0 : index
      %c0_16 = arith.constant 0 : index
      %35 = vector.load %arg4[%c0_15, %c0_16] : memref<1x32xf32, #tpu.memory_space<vmem>>, vector<1x32xf32>
      %36 = vector.broadcast %35 : vector<1x32xf32> to vector<16x32xf32>
      %37 = arith.addf %34, %36 : vector<16x32xf32>
      %38 = arith.mulf %37, %37 : vector<16x32xf32>
      %cst_17 = arith.constant dense<0.000000e+00> : vector<16xf32>
      %39 = vector.multi_reduction <add>, %38, %cst_17 [1] : vector<16x32xf32> to vector<16xf32>
      %40 = vector.shape_cast %39 : vector<16xf32> to vector<16x1xf32>
      %41 = math.sqrt %40 : vector<16x1xf32>
      %cst_18 = arith.constant 9.99999996E-13 : f32
      %42 = vector.broadcast %cst_18 : f32 to vector<16x1xf32>
      %43 = arith.maximumf %41, %42 : vector<16x1xf32>
      %44 = vector.broadcast %43 : vector<16x1xf32> to vector<16x32xf32>
      %45 = arith.divf %37, %44 : vector<16x32xf32>
      %c0_19 = arith.constant 0 : index
      %c0_20 = arith.constant 0 : index
      %46 = vector.load %arg8[%c0_19, %c0_20] : memref<16x32xf32, #tpu.memory_space<vmem>>, vector<16x32xf32>
      tpu.vector_store %arg8[%c0_19, %c0_20], %45 {strides = array<i32>} : memref<16x32xf32, #tpu.memory_space<vmem>>, vector<16x32xf32>,
      %cst_21 = arith.constant 0.000000e+00 : f32
      %c0_22 = arith.constant 0 : index
      %47 = memref.load %arg9[%c0_22] : memref<1xf32, #tpu.memory_space<smem>>
      memref.store %cst_21, %arg9[%c0_22] : memref<1xf32, #tpu.memory_space<smem>>
    } else {
    }
    %c8_i32 = arith.constant 8 : i32
    %3 = arith.muli %arg0, %c8_i32 : i32
    %4 = tpu.assume_multiple %3, 8 : i32
    %5 = arith.index_cast %4 : i32 to index
    %c0 = arith.constant 0 : index
    %6 = vector.load %arg8[%5, %c0] : memref<16x32xf32, #tpu.memory_space<vmem>>, vector<8x32xf32>
    %c0_1 = arith.constant 0 : index
    %c0_2 = arith.constant 0 : index
    %7 = vector.load %arg8[%c0_1, %c0_2] : memref<16x32xf32, #tpu.memory_space<vmem>>, vector<16x32xf32>
    %cst = arith.constant dense<0.000000e+00> : vector<8x16xf32>
    %8 = tpu.matmul %6, %7, %cst {dimension_numbers = #tpu.dot_dimension_numbers<[1], [1], [0], [0], [0, 0, 1, 0], [], []>} : vector<8x32xf32>, vector<16x32xf32>, vector<8x16xf32> -> vector<8x16xf32>
    %cst_3 = arith.constant dense<0xFF800000> : vector<8xf32>
    %9 = vector.multi_reduction <maximumf>, %8, %cst_3 [1] : vector<8x16xf32> to vector<8xf32>
    %10 = vector.shape_cast %9 : vector<8xf32> to vector<8x1xf32>
    %11 = vector.broadcast %10 : vector<8x1xf32> to vector<8x16xf32>
    %12 = arith.subf %8, %11 : vector<8x16xf32>
    %13 = math.exp %12 : vector<8x16xf32>
    %cst_4 = arith.constant dense<0.000000e+00> : vector<8xf32>
    %14 = vector.multi_reduction <add>, %13, %cst_4 [1] : vector<8x16xf32> to vector<8xf32>
    %15 = vector.shape_cast %14 : vector<8xf32> to vector<8x1xf32>
    %16 = math.log %15 : vector<8x1xf32>
    %17 = arith.addf %10, %16 : vector<8x1xf32>
    %18 = arith.mulf %6, %6 : vector<8x32xf32>
    %cst_5 = arith.constant dense<0.000000e+00> : vector<8xf32>
    %19 = vector.multi_reduction <add>, %18, %cst_5 [1] : vector<8x32xf32> to vector<8xf32>
    %20 = vector.shape_cast %19 : vector<8xf32> to vector<8x1xf32>
    %c0_6 = arith.constant 0 : index
    %21 = memref.load %arg9[%c0_6] : memref<1xf32, #tpu.memory_space<smem>>
    %22 = arith.subf %17, %20 : vector<8x1xf32>
    %23 = vector.shape_cast %22 : vector<8x1xf32> to vector<1x8x1xf32>
    %cst_7 = arith.constant dense<0.000000e+00> : vector<1xf32>
    %24 = vector.multi_reduction <add>, %23, %cst_7 [1, 2] : vector<1x8x1xf32> to vector<1xf32>
    %25 = vector.shape_cast %24 : vector<1xf32> to vector<1x1x1xf32>
    %26 = vector.extract %25[0, 0, 0] : f32 from vector<1x1x1xf32>
    %27 = arith.addf %21, %26 : f32
    %c0_8 = arith.constant 0 : index
    %28 = memref.load %arg9[%c0_8] : memref<1xf32, #tpu.memory_space<smem>>
    memref.store %27, %arg9[%c0_8] : memref<1xf32, #tpu.memory_space<smem>>
    %c1_i32 = arith.constant 1 : i32
    %29 = arith.cmpi eq, %arg0, %c1_i32 : i32
    %30 = arith.extui %29 : i1 to i32
    %c0_i32_9 = arith.constant 0 : i32
    %31 = arith.cmpi ne, %30, %c0_i32_9 : i32
    scf.if %31 {
      %c0_10 = arith.constant 0 : index
      %c0_11 = arith.constant 0 : index
      %32 = vector.load %arg2[%c0_10, %c0_11] : memref<4x8xf32, #tpu.memory_space<vmem>>, vector<4x8xf32>
      %c0_12 = arith.constant 0 : index
      %c0_13 = arith.constant 0 : index
      %33 = vector.load %arg3[%c0_12, %c0_13] : memref<8x32xf32, #tpu.memory_space<vmem>>, vector<8x32xf32>
      %cst_14 = arith.constant dense<0.000000e+00> : vector<4x32xf32>
      %34 = tpu.matmul %32, %33, %cst_14 {dimension_numbers = #tpu.dot_dimension_numbers<[1], [0], [0], [1], [0, 0, 1, 1], [], []>} : vector<4x8xf32>, vector<8x32xf32>, vector<4x32xf32> -> vector<4x32xf32>
      %c0_15 = arith.constant 0 : index
      %c0_16 = arith.constant 0 : index
      %35 = vector.load %arg4[%c0_15, %c0_16] : memref<1x32xf32, #tpu.memory_space<vmem>>, vector<1x32xf32>
      %36 = vector.broadcast %35 : vector<1x32xf32> to vector<4x32xf32>
      %37 = arith.addf %34, %36 : vector<4x32xf32>
      %38 = arith.mulf %37, %37 : vector<4x32xf32>
      %cst_17 = arith.constant dense<0.000000e+00> : vector<4xf32>
      %39 = vector.multi_reduction <add>, %38, %cst_17 [1] : vector<4x32xf32> to vector<4xf32>
      %40 = vector.shape_cast %39 : vector<4xf32> to vector<4x1xf32>
      %41 = math.sqrt %40 : vector<4x1xf32>
      %cst_18 = arith.constant 9.99999996E-13 : f32
      %42 = vector.broadcast %cst_18 : f32 to vector<4x1xf32>
      %43 = arith.maximumf %41, %42 : vector<4x1xf32>
      %44 = vector.broadcast %43 : vector<4x1xf32> to vector<4x32xf32>
      %45 = arith.divf %37, %44 : vector<4x32xf32>
      %cst_19 = arith.constant dense<0.000000e+00> : vector<4x4xf32>
      %46 = tpu.matmul %45, %45, %cst_19 {dimension_numbers = #tpu.dot_dimension_numbers<[1], [1], [0], [0], [0, 0, 1, 0], [], []>} : vector<4x32xf32>, vector<4x32xf32>, vector<4x4xf32> -> vector<4x4xf32>
      %c0_20 = arith.constant 0 : index
      %c0_21 = arith.constant 0 : index
      %47 = vector.load %arg7[%c0_20, %c0_21] : memref<4x4xf32, #tpu.memory_space<vmem>>, vector<4x4xf32>
      tpu.vector_store %arg7[%c0_20, %c0_21], %46 {strides = array<i32>} : memref<4x4xf32, #tpu.memory_space<vmem>>, vector<4x4xf32>,
      %c0_22 = arith.constant 0 : index
      %c0_23 = arith.constant 0 : index
      %48 = vector.load %arg5[%c0_22, %c0_23] : memref<4x64xbf16, #tpu.memory_space<vmem>>, vector<4x64xbf16>
      %cst_24 = arith.constant dense<0.000000e+00> : vector<4x4xf32>
      %49 = tpu.matmul %48, %48, %cst_24 {dimension_numbers = #tpu.dot_dimension_numbers<[1], [1], [0], [0], [0, 0, 1, 0], [], []>} : vector<4x64xbf16>, vector<4x64xbf16>, vector<4x4xf32> -> vector<4x4xf32>
      %50 = arith.extf %48 : vector<4x64xbf16> to vector<4x64xf32>
      %cst_25 = arith.constant dense<0.000000e+00> : vector<4xf32>
      %51 = vector.multi_reduction <add>, %50, %cst_25 [1] : vector<4x64xf32> to vector<4xf32>
      %52 = vector.shape_cast %51 : vector<4xf32> to vector<4x1xf32>
      %53 = tpu.transpose %52, [1, 0] : vector<4x1xf32> -> vector<1x4xf32>
      %54 = vector.broadcast %52 : vector<4x1xf32> to vector<4x4xf32>
      %55 = vector.broadcast %53 : vector<1x4xf32> to vector<4x4xf32>
      %56 = arith.addf %54, %55 : vector<4x4xf32>
      %57 = arith.subf %56, %49 : vector<4x4xf32>
      %58 = arith.divf %49, %57 : vector<4x4xf32>
      %cst_26 = arith.constant dense<0xFF800000> : vector<4xf32>
      %59 = vector.multi_reduction <maximumf>, %58, %cst_26 [1] : vector<4x4xf32> to vector<4xf32>
      %60 = vector.shape_cast %59 : vector<4xf32> to vector<4x1xf32>
      %61 = vector.broadcast %60 : vector<4x1xf32> to vector<4x4xf32>
      %62 = arith.subf %58, %61 : vector<4x4xf32>
      %63 = math.exp %62 : vector<4x4xf32>
      %cst_27 = arith.constant dense<0.000000e+00> : vector<4xf32>
      %64 = vector.multi_reduction <add>, %63, %cst_27 [1] : vector<4x4xf32> to vector<4xf32>
      %65 = vector.shape_cast %64 : vector<4xf32> to vector<4x1xf32>
      %66 = vector.broadcast %65 : vector<4x1xf32> to vector<4x4xf32>
      %67 = arith.divf %63, %66 : vector<4x4xf32>
      %cst_28 = arith.constant dense<0xFF800000> : vector<4xf32>
      %68 = vector.multi_reduction <maximumf>, %46, %cst_28 [1] : vector<4x4xf32> to vector<4xf32>
      %69 = vector.shape_cast %68 : vector<4xf32> to vector<4x1xf32>
      %70 = vector.broadcast %69 : vector<4x1xf32> to vector<4x4xf32>
      %71 = arith.subf %46, %70 : vector<4x4xf32>
      %72 = math.exp %71 : vector<4x4xf32>
      %cst_29 = arith.constant dense<0.000000e+00> : vector<4xf32>
      %73 = vector.multi_reduction <add>, %72, %cst_29 [1] : vector<4x4xf32> to vector<4xf32>
      %74 = vector.shape_cast %73 : vector<4xf32> to vector<4x1xf32>
      %75 = math.log %74 : vector<4x1xf32>
      %76 = arith.addf %69, %75 : vector<4x1xf32>
      %77 = tpu.transpose %76, [1, 0] : vector<4x1xf32> -> vector<1x4xf32>
      %78 = vector.broadcast %76 : vector<4x1xf32> to vector<4x4xf32>
      %79 = vector.broadcast %77 : vector<1x4xf32> to vector<4x4xf32>
      %80 = arith.addf %78, %79 : vector<4x4xf32>
      %cst_30 = arith.constant 2.000000e+00 : f32
      %81 = vector.broadcast %cst_30 : f32 to vector<4x4xf32>
      %82 = arith.mulf %81, %46 : vector<4x4xf32>
      %83 = arith.subf %80, %82 : vector<4x4xf32>
      %84 = arith.mulf %67, %83 : vector<4x4xf32>
      %85 = vector.shape_cast %84 : vector<4x4xf32> to vector<1x4x4xf32>
      %cst_31 = arith.constant dense<0.000000e+00> : vector<1xf32>
      %86 = vector.multi_reduction <add>, %85, %cst_31 [1, 2] : vector<1x4x4xf32> to vector<1xf32>
      %87 = vector.shape_cast %86 : vector<1xf32> to vector<1x1x1xf32>
      %88 = vector.extract %87[0, 0, 0] : f32 from vector<1x1x1xf32>
      %cst_32 = arith.constant 2.500000e-01 : f32
      %89 = arith.mulf %88, %cst_32 : f32
      %c0_33 = arith.constant 0 : index
      %90 = memref.load %arg9[%c0_33] : memref<1xf32, #tpu.memory_space<smem>>
      %cst_34 = arith.constant 6.250000e-02 : f32
      %91 = arith.mulf %90, %cst_34 : f32
      %cst_35 = arith.constant 5.000000e-01 : f32
      %92 = arith.mulf %cst_35, %91 : f32
      %cst_36 = arith.constant 5.000000e-01 : f32
      %93 = arith.mulf %cst_36, %89 : f32
      %94 = arith.addf %92, %93 : f32
      %c0_37 = arith.constant 0 : index
      %95 = memref.load %arg6[%c0_37] : memref<3xf32, #tpu.memory_space<smem>>
      memref.store %94, %arg6[%c0_37] : memref<3xf32, #tpu.memory_space<smem>>
      %c1 = arith.constant 1 : index
      %96 = memref.load %arg6[%c1] : memref<3xf32, #tpu.memory_space<smem>>
      memref.store %91, %arg6[%c1] : memref<3xf32, #tpu.memory_space<smem>>
      %c2 = arith.constant 2 : index
      %97 = memref.load %arg6[%c2] : memref<3xf32, #tpu.memory_space<smem>>
      memref.store %89, %arg6[%c2] : memref<3xf32, #tpu.memory_space<smem>>
    } else {
    }
    return
  }
  func.func @transform_0(%arg0: i32) -> (i32, i32) {
    %c0_i32 = arith.constant 0 : i32
    %c0_i32_0 = arith.constant 0 : i32
    %c0_i32_1 = arith.constant 0 : i32
    return %c0_i32, %c0_i32_0 : i32, i32
  }
  func.func @transform_1(%arg0: i32) -> (i32, i32) {
    %c0_i32 = arith.constant 0 : i32
    %c0_i32_0 = arith.constant 0 : i32
    %c0_i32_1 = arith.constant 0 : i32
    return %c0_i32, %c0_i32_0 : i32, i32
  }
  func.func @transform_2(%arg0: i32) -> (i32, i32) {
    %c0_i32 = arith.constant 0 : i32
    %c0_i32_0 = arith.constant 0 : i32
    %c0_i32_1 = arith.constant 0 : i32
    return %c0_i32, %c0_i32_0 : i32, i32
  }
  func.func @transform_3(%arg0: i32) -> (i32, i32) {
    %c0_i32 = arith.constant 0 : i32
    %c0_i32_0 = arith.constant 0 : i32
    %c0_i32_1 = arith.constant 0 : i32
    return %c0_i32, %c0_i32_0 : i32, i32
  }
  func.func @transform_4(%arg0: i32) -> (i32, i32) {
    %c0_i32 = arith.constant 0 : i32
    %c0_i32_0 = arith.constant 0 : i32
    %c0_i32_1 = arith.constant 0 : i32
    return %c0_i32, %c0_i32_0 : i32, i32
  }
  func.func @transform_5(%arg0: i32) -> i32 {
    %c0_i32 = arith.constant 0 : i32
    %c0_i32_0 = arith.constant 0 : i32
    return %c0_i32 : i32
  }
  func.func @transform_6(%arg0: i32) -> (i32, i32) {
    %c0_i32 = arith.constant 0 : i32
    %c0_i32_0 = arith.constant 0 : i32
    %c0_i32_1 = arith.constant 0 : i32
    return %c0_i32, %c0_i32_0 : i32, i32
  }
}

</mosaic_0001>

<bundles_post_ra>
// kernel: kmgcl_forward.1
= control target key start
LH: loop header
LB: loop body
LE: loop exit
PB: predicated region body
PF: predicated region fallthrough
CT: control target
= control target key end

     0   :  { %12 = vsyncpa [#allocation6], 0  ;;  %s1192_s0 = inlined_call_operand.vmem [shape: f32[16,8], index: 0, kind: input, shape index: {}]   ;;  %s1193_s1 = inlined_call_operand.vmem [shape: f32[4,8], index: 1, kind: input, shape index: {}]   ;;  %s1194_s2 = inlined_call_operand.vmem [shape: f32[8,32], index: 2, kind: input, shape index: {}]   ;;  %s1195_s3 = inlined_call_operand.vmem [shape: f32[1,32], index: 3, kind: input, shape index: {}]   ;;  %s1196_s4 = inlined_call_operand.vmem [shape: bf16[4,64], index: 4, kind: input, shape index: {}]   ;;  %s1197_s5 = inlined_call_operand.vmem [shape: f32[3], index: 5, kind: output, shape index: {0}]   ;;  %s1198_s6 = inlined_call_operand.hbm [shape: f32[4,4], index: 6, kind: output, shape index: {1}]  }
   0x1   :  { %13 = vsyncpa [#allocation5], 0  ;;  %s1102_s21 = smov 0  }
   0x2 LB: > { %s1108_s22 = sadd.s32 4294967295, %s1057_s21   ;;  %p880_p0 = scmp.ge.s32.totalorder %s1057_s21, 1  ;;  %s1057_s21 = sphi %s1102_s21, %s19_s21  }
   0x3   : > { %p197_p1 = scmp.lt.s32.totalorder %s1057_s21, 3 }
   0x5   : > { %p198_p2 = pnand %p880_p0, %p197_p1 }
   0x6   : > { %p881_p3 = scmp.ne.s32.totalorder (!%p198_p2), %s1108_s22, 0 }
   0x7   : > { %201 = sbr.rel (%p198_p2) target bundleno = 1895 (0x767), region = 40 }
   0xe   : > { %221 = sbr.rel (%p881_p3) target bundleno = 412 (0x19c), region = 44  ;;  %v224_v0 = vld [vmem:[%s1194_s2] sm:$0xff] (!%p881_p3)  ;;  %vm232_vm0 = vcmask (!%p881_p3), 64512   ;;  %v223_v2 = vld [vmem:[%s1192_s0 + $0x8] sm:$0xff] (!%p881_p3)  ;;  %vm316_vm1 = vcmask (!%p881_p3), 261120   ;;  %s1059_s7 = smov (!%p881_p3), 0.0  }
   0xf   : > { %v222_v1 = vld [vmem:[%s1192_s0] sm:$0xff] (!%p881_p3)  ;;  %913 = vmatprep.subr.mxu0 (!%p881_p3), %v224_v0  ;;  %346 = sst [smem:[#allocation3]] (!%p881_p3), %s1059_s7 }
  0x10   : > { %915 = vmatprep.mubr.msk.f32.mxu0 (!%p881_p3), %vm232_vm0, %v222_v1  ;;  %914 = vmatpush3.msra.mxu0 (!%p881_p3), %v224_v0  ;;  %v882_v3 = vld [vmem:[%s1195_s3] ss:$0 sm:$0xff] (!%p881_p3) }
  0x11   : > { %916 = vmatmul.mubr.msk.f32.vlgmr.msra.gmra.mrb[0].mxu0 (!%p881_p3), %vm232_vm0, %v223_v2 }
  0xe4   : > { %v917_v4 = vpop.f32.mrb[0].mxu0 }
  0xe5   : > { %v305_v5 = vpop.f32.mrb[1].mxu0  ;;  %v311_v6 = vadd.f32 %v917_v4, %v882_v3 }
  0xe6   : > { %v306_v7 = vadd.f32 %v882_v3, %v305_v5 }
  0xe7   : > { %v315_v10 = vmul.f32 %v311_v6, %v311_v6 }
  0xe8   : > { %v314_v8 = vmul.f32 %v306_v7, %v306_v7 }
  0xe9   : > { %v320_v11 = vsel %vm316_vm1, %v315_v10, 0.0 }
  0xea   : > { %v317_v9 = vsel %vm316_vm1, %v314_v8, 0.0 }
  0xeb   : > { %318 = vadd.xlane.f32.xlu0 %v317_v9 }
  0xef   : > { %321 = vadd.xlane.f32.xlu0 %v320_v11 }
 0x178   : > { %v319_v12 = vpop.xlane.xlu0 %318 }
 0x179   : > { %977 = vrsqrt.f32 %v319_v12  ;;  %vm325_vm2 = vcmp.eq.f32.partialorder %v319_v12, inf  ;;  %v328_v16 = vand.u32 2147483648, %v319_v12  ;;  %vm327_vm3 = vcmp.eq.f32.partialorder %v319_v12, 0.0 }
 0x17c   : > { %v322_v13 = vpop.xlane.xlu0 %321 }
 0x17d   : > { %979 = vrsqrt.f32 %v322_v13  ;;  %vm332_vm4 = vcmp.eq.f32.partialorder %v322_v13, inf  ;;  %v335_v22 = vand.u32 2147483648, %v322_v13  ;;  %vm334_vm5 = vcmp.eq.f32.partialorder %v322_v13, 0.0 }
 0x183   : > { %v978_v14 = vpop.eup %977 }
 0x184   : > { %v324_v15 = vmul.f32 %v978_v14, %v319_v12 }
 0x186   : > { %v326_v17 = vsel %vm325_vm2, %v319_v12, %v324_v15 }
 0x187   : > { %v980_v18 = vpop.eup %979  ;;  %v329_v19 = vsel %vm327_vm3, %v328_v16, %v326_v17 }
 0x188   : > { %v337_v20 = vmax.f32 %v329_v19, 1e-12  ;;  %v331_v21 = vmul.f32 %v980_v18, %v322_v13 }
 0x18a   : > { %981 = vrcp.f32 %v337_v20  ;;  %v333_v23 = vsel %vm332_vm4, %v322_v13, %v331_v21 }
 0x18b   : > { %v336_v24 = vsel %vm334_vm5, %v335_v22, %v333_v23 }
 0x18c   : > { %v338_v25 = vmax.f32 %v336_v24, 1e-12 }
 0x18e   : > { %983 = vrcp.f32 %v338_v25 }
 0x194   : > { %v982_v26 = vpop.eup %981 }
 0x195   : > { %v340_v27 = vmul.f32 %v982_v26, %v306_v7 }
 0x197   : > { %343 = vst.msk [vmem:[#allocation2] sm:$0xff] %vm316_vm1, %v340_v27 }
 0x198   : > { %v984_v28 = vpop.eup %983 }
 0x199   : > { %v342_v29 = vmul.f32 %v984_v28, %v311_v6 }
 0x19b   : > { %344 = vst.msk [vmem:[#allocation2 + $0x8] sm:$0xff] %vm316_vm1, %v342_v29 }
 0x19c PF: > { %vm352_vm6 = vcmask 261120   ;;  %v1060_v32 = vmov 0.0|0.0   ;;  %vm1061_vm8 = vmmov 0   ;;  %v1062_v34 = vmov 0.0   ;;  %s885_s8 = sshll.u32 %s1108_s22, 3  ;;  %s449_s10 = sld [smem:[#allocation3]] }
 0x19d   : > { %941 = vmatprep.subr.bf16.mxu0 %v1060_v32  ;;  %vm943_vm7 = vmpackc.low %vm352_vm6, %vm352_vm6  ;;  %922 = vmatprep.mubr.msk.f32.mxu0 %vm1061_vm8, %v1062_v34  ;;  %s348_s9 = scalar_lea.vmem [#allocation2], %s885_s8  ;;  %vm432_vm9 = vcmask 130048   ;;  %vm451_vm10 = vcmask 7168   ;;  %p889_p4 = scmp.ne.s32.totalorder %s1108_s22, 1 }
 0x19e   : > { %v350_v30 = vld [vmem:[#allocation2] sm:$0xff]  ;;  %vm478_vm11 = vcmask (!%p889_p4), 64512   ;;  %v1063_v62 = vmov (!%p889_p4), 0.0   ;;  %vm1064_vm12 = vmmov (!%p889_p4), 0   ;;  %vm643_vm13 = vcmask (!%p889_p4), 523264  }
 0x19f   : > { %v470_v60 = vld [vmem:[%s1194_s2] sm:$0xff] (!%p889_p4)  ;;  %925 = vmatprep.subr.mxu1 (!%p889_p4), %v1063_v62  ;;  %927 = vmatprep.mubr.msk.f32.mxu1 (!%p889_p4), %vm1064_vm12, %v1063_v62  ;;  %vm553_vm14 = vcmask (!%p889_p4), 257024   ;;  %vm688_vm15 = vcmask (!%p889_p4), 519168   ;;  %v724_v23 = vlaneseq (!%p889_p4)  ;;  %vm640_vm2 = vcmask (!%p889_p4), 27648  }
 0x1a0   : > { %v469_v61 = vld [vmem:[%s1193_s1] sm:$0xf] (!%p889_p4)  ;;  %926 = vmatpush3.msra.mxu1 (!%p889_p4), %v470_v60 }
 0x1a1   : > { %928 = vmatmul.mubr.msk.f32.vlgmr.msra.gmra.mrb[0].mxu1 (!%p889_p4), %vm478_vm11, %v469_v61  ;;  %930 = vmatprep.subr.mxu1 (!%p889_p4), %v1063_v62  ;;  %v642_v63 = vld [vmem:[%s1196_s4] sm:$0x3] (!%p889_p4)  ;;  %v725_v24 = vshrl.u32 (!%p889_p4), %v724_v23, 7 }
 0x1a2   : > { %v351_v31 = vld [vmem:[#allocation2 + $0x8] sm:$0xff]  ;;  %v349_v35 = vld [vmem:[%s348_s9] sm:$0xff]  ;;  %932 = vmatprep.mubr.msk.f32.mxu1 (!%p889_p4), %vm1064_vm12, %v1063_v62  ;;  %v645_v0 = vsel (!%p889_p4), %vm643_vm13, %v642_v63, 0  ;;  %v687_v6 = vunpack.c.l.bf16 (!%p889_p4), %v642_v63 }
 0x1a3   : > { %v942_v33 = vpack.c.bf16 %v351_v31, %v350_v30  ;;  %v445_v39 = vmul.f32 %v349_v35, %v349_v35  ;;  %v890_v1 = vld [vmem:[%s1195_s3] ss:$0 sm:$0xff] (!%p889_p4)  ;;  %v726_v25 = vsub.s32 (!%p889_p4), 0, %v725_v24 }
 0x1a4   : > { %v689_v8 = vsel (!%p889_p4), %vm688_vm15, %v687_v6, 0.0 }
 0x1a5   : > { %944 = vmatpush3.bf16.xpose.msk.msra.mxu0 %vm943_vm7, %v942_v33  ;;  %v446_v40 = vsel %vm352_vm6, %v445_v39, 0.0 }
 0x1a6   : > { %447 = vadd.xlane.f32.xlu1 %v446_v40  ;;  %935 = vmatprep.subr.bf16.mxu0 (!%p889_p4), %v1063_v62 }
 0x1ac   : > { %923 = vmatmul.mubr.msk.f32.vlgmr.msra.gmra.mrb[0].mxu0 %vm352_vm6, %v349_v35 }
 0x1ad   : > { %937 = vmatprep.mubr.msk.bf16.mxu0 (!%p889_p4), %vm1064_vm12, %v1063_v62  ;;  %936 = vmatpush3.bf16.xpose.msra.mxu0 (!%p889_p4), %v645_v0 }
 0x233   : > { %v448_v49 = vpop.xlane.xlu1 %447 }
 0x274   : > { %v548_v2 = vpop.f32.mrb[0].mxu1 (!%p889_p4) }
 0x275   : > { %v549_v3 = vadd.f32 (!%p889_p4), %v890_v1, %v548_v2  ;;  %v929_v4 = vpop.f32.mrb[1].mxu1 (!%p889_p4) }
 0x277   : > { %v552_v5 = vmul.f32 (!%p889_p4), %v549_v3, %v549_v3 }
 0x279   : > { %v554_v7 = vsel (!%p889_p4), %vm553_vm14, %v552_v5, 0.0 }
 0x27f   : > { %v428_v36 = vpop.f32.mrb[0].mxu0 }
 0x280   : > { %v924_v37 = vpop.f32.mrb[1].mxu0  ;;  %v433_v38 = vsel %vm432_vm9, %v428_v36, -inf  ;;  %938 = vmatmul.mubr.msk.bf16.vlgmr.msra.gmra.mrb[0].mxu0 (!%p889_p4), %vm643_vm13, %v642_v63 }
 0x281   : > { %434 = vmax.xlane.f32.xlu0 %v433_v38 }
 0x30e   : > { %v435_v41 = vpop.xlane.xlu0 %434 }
 0x30f   : > { %v436_v42 = vsub.f32 %v428_v36, %v435_v41 }
 0x311   : > { %v437_v43 = vmul.f32 1.442695, %v436_v42 }
 0x313   : > { %985 = vpow2.f32 %v437_v43 }
 0x31d   : > { %v986_v44 = vpop.eup %985 }
 0x31e   : > { %v439_v45 = vsel %vm432_vm9, %v986_v44, 0.0 }
 0x31f   : > { %440 = vadd.xlane.f32.xlu0 %v439_v45 }
 0x323   : > { %555 = vadd.xlane.f32.xlu0 (!%p889_p4), %v554_v7 }
 0x327   : > { %690 = vadd.xlane.f32.xlu0 (!%p889_p4), %v689_v8 }
 0x353   : > { %v681_v11 = vpop.f32.mrb[0].mxu0 (!%p889_p4) }
 0x354   : > { %v939_v12 = vpop.f32.mrb[1].mxu0 (!%p889_p4) }
 0x355   : > { %v684_v13 = vpop.f32.mrb[2].mxu0 (!%p889_p4) }
 0x356   : > { %v940_v15 = vpop.f32.mrb[3].mxu0 (!%p889_p4) }
 0x3ac   : > { %v441_v46 = vpop.xlane.xlu0 %440 }
 0x3ad   : > { %987 = vlog2.f32 %v441_v46 }
 0x3b0   : > { %v556_v9 = vpop.xlane.xlu0 (!%p889_p4), %555 }
 0x3b1   : > { %989 = vrsqrt.f32 (!%p889_p4), %v556_v9  ;;  %vm559_vm0 = vcmp.eq.f32.partialorder (!%p889_p4), %v556_v9, inf  ;;  %v562_v17 = vand.u32 (!%p889_p4), 2147483648, %v556_v9  ;;  %vm561_vm1 = vcmp.eq.f32.partialorder (!%p889_p4), %v556_v9, 0.0 }
 0x3b4   : > { %v691_v10 = vpop.xlane.xlu0 (!%p889_p4), %690 }
 0x3b7   : > { %v988_v47 = vpop.eup %987 }
 0x3b8   : > { %v443_v48 = vmul.f32 0.6931472, %v988_v47 }
 0x3ba   : > { %v444_v50 = vadd.f32 %v443_v48, %v435_v41 }
 0x3bb   : > { %v990_v14 = vpop.eup (!%p889_p4), %989 }
 0x3bc   : > { %v450_v51 = vsub.f32 %v444_v50, %v448_v49  ;;  %v558_v16 = vmul.f32 (!%p889_p4), %v990_v14, %v556_v9 }
 0x3be   : > { %v452_v52 = vsel %vm451_vm10, %v450_v51, 0.0  ;;  %v560_v18 = vsel (!%p889_p4), %vm559_vm0, %v556_v9, %v558_v16 }
 0x3bf   : > { %453 = vadd.xlane.f32.xlu1 %v452_v52  ;;  %v563_v19 = vsel (!%p889_p4), %vm561_vm1, %v562_v17, %v560_v18 }
 0x3c0   : > { %v564_v20 = vmax.f32 (!%p889_p4), %v563_v19, 1e-12 }
 0x3c2   : > { %991 = vrcp.f32 (!%p889_p4), %v564_v20 }
 0x3cc   : > { %v992_v21 = vpop.eup (!%p889_p4), %991 }
 0x3cd   : > { %v566_v22 = vmul.f32 (!%p889_p4), %v992_v21, %v549_v3 }
 0x3cf   : > { %931 = vmatpush3.xpose.msk.msra.mxu1 (!%p889_p4), %vm352_vm6, %v566_v22 }
 0x3d2   : > { %933 = vmatmul.mubr.msk.f32.vlgmr.msra.gmra.mrb[2].mxu1 (!%p889_p4), %vm352_vm6, %v566_v22 }
 0x3f2   : > { %692 = vxpose.xlu1.b32.start.end [1/1] (short) (narrow) (!%p889_p4), %v691_v10, 8 }
 0x44c   : > { %v454_v53 = vpop.xlane.xlu1 %453 }
 0x44d   : > { %v455_v54 = vrot.slane %v454_v53, 4 }
 0x44f   : > { %v456_v55 = vadd.f32 %v455_v54, %v454_v53 }
 0x451   : > { %v457_v56 = vrot.slane %v456_v55, 2 }
 0x453   : > { %v458_v57 = vadd.f32 %v457_v56, %v456_v55 }
 0x455   : > { %v459_v58 = vrot.slane %v458_v57, 1 }
 0x457   : > { %v460_v59 = vadd.f32 %v459_v58, %v458_v57 }
 0x459   : > { %945 = vpush %v460_v59 }
 0x472   : > { %v708_v26 = vpop.trf.xlu1 (!%p889_p4) }
 0x473   : > { %v727_v27 = vrot.slane (!%p889_p4), %v708_v26, %v726_v25 }
 0x475   : > { %v728_v28 = vadd.f32 (!%p889_p4), %v727_v27, %v691_v10 }
 0x477   : > { %v729_v29 = vsub.f32 (!%p889_p4), %v728_v28, %v681_v11 }
 0x479   : > { %993 = vrcp.f32 (!%p889_p4), %v729_v29 }
 0x483   : > { %v994_v30 = vpop.eup (!%p889_p4), %993 }
 0x484   : > { %v731_v31 = vmul.f32 (!%p889_p4), %v994_v30, %v681_v11 }
 0x486   : > { %v732_v32 = vsel (!%p889_p4), %vm640_vm2, %v731_v31, -inf }
 0x487   : > { %468 = sbr.rel (%p889_p4) target bundleno = 1855 (0x73f), region = 48  ;;  %733 = vmax.xlane.f32.xlu0 (!%p889_p4), %v732_v32 }
 0x48a   : > { %s946_s11 = spop %945 }
 0x48b   : > { %s462_s12 = sadd.f32 %s946_s11, %s449_s10 }
 0x48d   : > { %464 = sst [smem:[#allocation3]] %s462_s12 }
 0x48e   : > { %s806_s23 = sld [smem:[#allocation3]] }
 0x494   : > { %s807_s24 = smul.f32 0.0625, %s806_s23 }
 0x496   : > { %814 = sst [smem:[#allocation4 + $0x1]] %s807_s24  ;;  %s808_s26 = smul.f32 0.5, %s807_s24 }
 0x4a5   : > { %v636_v33 = vpop.f32.mrb[2].mxu1 }
 0x4a6   : > { %641 = vst.msk [vmem:[#allocation7] sm:$0xf] %vm640_vm2, %v636_v33  ;;  %v934_v34 = vpop.f32.mrb[3].mxu1  ;;  %v743_v35 = vsel %vm640_vm2, %v636_v33, -inf  ;;  %v792_v54 = vmul.f32 2.0, %v636_v33 }
 0x4a7   : > { %744 = vmax.xlane.f32.xlu1 %v743_v35 }
 0x514   : > { %v734_v36 = vpop.xlane.xlu0 %733 }
 0x515   : > { %v735_v37 = vsub.f32 %v731_v31, %v734_v36 }
 0x517   : > { %v736_v40 = vmul.f32 1.442695, %v735_v37 }
 0x534   : > { %v745_v38 = vpop.xlane.xlu1 %744 }
 0x535   : > { %v746_v39 = vsub.f32 %v636_v33, %v745_v38 }
 0x537   : > { %v747_v41 = vmul.f32 1.442695, %v746_v39 }
 0x539   : > { %995 = vpow2.f32 %v747_v41 }
 0x53a   : > { %997 = vpow2.f32 %v736_v40 }
 0x543   : > { %v996_v42 = vpop.eup %995 }
 0x544   : > { %v749_v43 = vsel %vm640_vm2, %v996_v42, 0.0  ;;  %v998_v44 = vpop.eup %997 }
 0x545   : > { %750 = vadd.xlane.f32.xlu0 %v749_v43  ;;  %v738_v45 = vsel %vm640_vm2, %v998_v44, 0.0 }
 0x549   : > { %739 = vadd.xlane.f32.xlu0 %v738_v45 }
 0x5d2   : > { %v751_v46 = vpop.xlane.xlu0 %750 }
 0x5d3   : > { %999 = vlog2.f32 %v751_v46 }
 0x5d6   : > { %v740_v50 = vpop.xlane.xlu0 %739 }
 0x5d7   : > { %1001 = vrcp.f32 %v740_v50 }
 0x5dd   : > { %v1000_v47 = vpop.eup %999 }
 0x5de   : > { %v753_v48 = vmul.f32 0.6931472, %v1000_v47 }
 0x5e0   : > { %v754_v49 = vadd.f32 %v753_v48, %v745_v38 }
 0x5e1   : > { %v1002_v53 = vpop.eup %1001 }
 0x5e2   : > { %755 = vxpose.xlu0.b32.start.end [1/1] (short) (narrow) %v754_v49, 8  ;;  %v742_v56 = vmul.f32 %v1002_v53, %v998_v44 }
 0x662   : > { %v771_v51 = vpop.trf.xlu0 }
 0x663   : > { %v790_v52 = vrot.slane %v771_v51, %v726_v25 }
 0x665   : > { %v791_v55 = vadd.f32 %v790_v52, %v754_v49 }
 0x667   : > { %v793_v57 = vsub.f32 %v791_v55, %v792_v54 }
 0x669   : > { %v794_v58 = vmul.f32 %v793_v57, %v742_v56 }
 0x66b   : > { %v795_v59 = vsel %vm640_vm2, %v794_v58, 0.0 }
 0x66c   : > { %796 = vadd.xlane.f32.xlu1 %v795_v59 }
 0x6f9   : > { %v797_v60 = vpop.xlane.xlu1 %796 }
 0x6fa   : > { %v798_v61 = vrot.slane %v797_v60, 4 }
 0x6fc   : > { %v799_v62 = vadd.f32 %v798_v61, %v797_v60 }
 0x6fe   : > { %v800_v63 = vrot.slane %v799_v62, 2 }
 0x700   : > { %v801_v0 = vadd.f32 %v800_v63, %v799_v62 }
 0x702   : > { %v802_v1 = vrot.slane %v801_v0, 1 }
 0x704   : > { %v803_v2 = vadd.f32 %v802_v1, %v801_v0 }
 0x706   : > { %947 = vpush %v803_v2 }
 0x737   : > { %s948_s25 = spop %947 }
 0x738   : > { %s805_s27 = smul.f32 0.25, %s948_s25 }
 0x73a   : > { %s809_s28 = smul.f32 0.5, %s805_s27  ;;  %816 = sst [smem:[#allocation4 + $0x2]] %s805_s27 }
 0x73c   : > { %s810_s29 = sadd.f32 %s809_s28, %s808_s26 }
 0x73e   : > { %812 = sst [smem:[#allocation4]] %s810_s29 }
 0x73f PF: > { %p957_p5 = scmp.eq.s32.totalorder %s1108_s22, 1  ;;  %s824_s8 = sshll.u32 %s1197_s5, 4  ;;  %s825_s8 = int_to_ptr.vmem [resolvable:$true] %s824_s8 }
 0x740   : > { %s1003_s9 = scalar_lea.vmem %s825_s8, 16  ;;  %p1010_p9 = scmp.lt.s32.totalorder %s825_s8, %s825_s8 }
 0x741   : > { %p1004_p6 = scmp.ne.s32.totalorder %s825_s8, %s1003_s9  ;;  %p1011_p10 = scmp.lt.s32.totalorder %s1003_s9, %s1003_s9 }
 0x743   : > { %p1005_p7 = pnand %p1004_p6, %p957_p5  ;;  %p1012_p11 = por %p1011_p10, %p1010_p9 }
 0x745   : > { %p1006_p8 = pneg %p1005_p7 }
 0x747   : > { %p1013_p12 = pnand %p1012_p11, %p1006_p8 }
 0x749   : > { %1016 = shalt.err (!%p1013_p12)
}
 0x74a   : > { %s1065_s10 = smov [#allocation4]   ;;  %s1066_s11 = smov [#allocation7]  }
 0x74b   : > { %950 = dma.smem_to_vmem (%p957_p5), %s1065_s10, 16, %s825_s8, [#allocation6]  }
 0x74c   : > { %s835_s12 = sshll.u32 %s1066_s11, 4  ;;  %s836_s12 = int_to_ptr.vmem [resolvable:$true] %s835_s12 }
 0x74d   : > { %s1017_s13 = scalar_lea.vmem %s836_s12, 64  ;;  %p1024_p2 = scmp.lt.s32.totalorder %s836_s12, %s836_s12 }
 0x74e   : > { %p1018_p13 = scmp.ne.s32.totalorder %s836_s12, %s1017_s13  ;;  %p1025_p3 = scmp.lt.s32.totalorder %s1017_s13, %s1017_s13 }
 0x750   : > { %p1019_p0 = pnand %p1018_p13, %p957_p5  ;;  %p1026_p4 = por %p1025_p3, %p1024_p2 }
 0x752   : > { %p1020_p1 = pneg %p1019_p0 }
 0x754   : > { %p1027_p6 = pnand %p1026_p4, %p1020_p1 }
 0x756   : > { %1030 = shalt.err (!%p1027_p6)
}
 0x757   : > { %s1031_s16 = scalar_lea.hbm %s1198_s6, 64 }
 0x758   : > { %p1032_p7 = scmp.ne.s32.totalorder %s1198_s6, %s1031_s16  ;;  %p1037_p10 = scmp.lt.u32.totalorder %s1031_s16, %s1198_s6 }
 0x75a   : > { %p1033_p8 = pnand %p1032_p7, %p957_p5 }
 0x75c   : > { %p1034_p9 = pneg %p1033_p8 }
 0x75e   : > { %p1039_p11 = pnand %p1037_p10, %p1034_p9 }
 0x760   : > { %1042 = shalt.err (!%p1039_p11)
}
 0x761   : > { %952 = dma.vmem_to_hbm [thread:$0]  (%p957_p5), %s836_s12, 64, %s1198_s6, [#allocation5]  }
 0x762   : > { %1048 = dma.done.wait (%p957_p5), [#allocation6], 16  }
 0x763   : > { %1050 = vsyncadd (%p957_p5), [#allocation6], 4294967280 }
 0x764   : > { %1052 = dma.done.wait (%p957_p5), [#allocation5], 64  }
 0x765   : > { %1054 = vsyncadd (%p957_p5), [#allocation5], 4294967232 }
 0x766   : > { %847 = sfence }
 0x767 PF: > { %s19_s21 = sadd.s32 1, %s1057_s21  }
 0x768   : > { %p16_p12 = scmp.ge.s32.totalorder %s19_s21, 4  }
 0x76a   :  { %18 = sbr.rel (!%p16_p12) target bundleno = 2 (0x2), region = 87 }
 0x771   :  { %853 = vsyncpa [#allocation5], 1 }
 0x772   :  { %855 = vsyncpa [#allocation5 + $0x1], 1 }
 0x773   :  { %856 = vsyncpa [#allocation6], 1 }
 0x774   :  { %858 = vsyncpa [#allocation6 + $0x1], 1 }

</bundles_post_ra>
